<compile_context>
chip_gen: v5e
topology: v5e:2x2
jax: 0.10.0
libtpu: 0.0.40
codegen_flags: <defaults>
</compile_context>

<pallas_src>
import functools

import jax
import jax.numpy as jnp
from jax.experimental import pallas as pl
from jax.experimental.pallas import tpu as pltpu

_LANES = 128
_ROW_ALIGN = 32                       # safe for bf16/int8 sublane packing
_TARGET_BLOCK_BYTES = 4 * 1024 * 1024  # ~4 MiB per block per buffer
_MIN_TILE_ROWS = 512                  # don't shrink blocks below 256 KiB (f32)
_TARGET_PROGRAMS = 8                  # aim for >=8 grid steps -> overlap + 2 TCs
_VMEM_LIMIT_BYTES = 32 * 1024 * 1024  # in+out, double buffered, 4 MiB blocks = 16 MiB
_DEFAULT_MIN_PALLAS_BYTES = 256 * 1024


def _round_up(x, m):
    return ((x + m - 1) // m) * m


def _select_tile_rows(rows, itemsize):
    """Pick a row-tile: ~4 MiB blocks, >=~8 programs, multiple of 32 rows."""
    cap = max(_ROW_ALIGN,
              (_TARGET_BLOCK_BYTES // (_LANES * itemsize)) // _ROW_ALIGN * _ROW_ALIGN)
    want = _round_up(pl.cdiv(rows, _TARGET_PROGRAMS), _ROW_ALIGN)
    tile = min(cap, max(_MIN_TILE_ROWS, want))
    if tile >= rows:
        # Single full block; block_shape == full array dims is always legal.
        tile = rows
    return tile


def _nonlinearity_kernel(x_ref, o_ref, *, kind):
    # NOTE: with a cdiv grid the last block may be partial; the padding rows
    # of x_ref hold unspecified values.  Harmless here because every op is
    # elementwise and the padded output rows are masked on store -- do not
    # reuse this pattern for reductions/masked variants without fixing it.
    x = x_ref[...]

    if kind == "relu":
        o_ref[...] = jnp.maximum(x, jnp.zeros_like(x))
        return

    # Transcendentals: compute narrow floats / ints in f32.
    # TODO(synk): on v6e/v7x the VPU/EUP are bf16-capable and this upcast could
    # be skipped; kept unconditionally (v5e-safe) since the kernel is HBM-bound
    # and the cast cost is hidden under the DMA.
    xc = x if x.dtype == jnp.float32 else x.astype(jnp.float32)

    if kind == "tanh":
        y = jnp.tanh(xc)
    elif kind == "sigmoid":
        # One EUP op + cheap VPU mul/add; numerically stable for large |x|.
        # (May differ from jax.nn.sigmoid by a few ULPs.)
        y = 0.5 * jnp.tanh(0.5 * xc) + 0.5
    else:
        raise ValueError(f"Non linear function {kind} is not supported")

    o_ref[...] = y.astype(o_ref.dtype)


def _apply_jnp(x, kind):
    """Plain-JAX reference path (small inputs / <128-element tails)."""
    if kind == "relu":
        return jnp.maximum(x, jnp.zeros_like(x))
    xc = x if x.dtype == jnp.float32 else x.astype(jnp.float32)
    if kind == "tanh":
        return jnp.tanh(xc)
    if kind == "sigmoid":
        return 0.5 * jnp.tanh(0.5 * xc) + 0.5
    raise ValueError(f"Non linear function {kind} is not supported")


class NonLinearity:
    """JAX/Pallas equivalent of garage's NonLinearity wrapper.

    Args:
        non_linear (str): name of the non-linearity to wrap
            ("tanh", "relu", "sigmoid").
        min_pallas_bytes (int): below this input size, use plain jnp
            (launch/plumbing overhead dominates for tiny activations).
    """

    # TODO(synk): the original module accepts an arbitrary callable/module;
    # here only named elementwise non-linearities are supported.
    def __init__(self, non_linear="tanh", *,
                 min_pallas_bytes=_DEFAULT_MIN_PALLAS_BYTES):
        if not isinstance(non_linear, str) or non_linear not in (
                "tanh", "relu", "sigmoid"):
            raise ValueError(
                "Non linear function {} is not supported".format(non_linear))
        self._kind = non_linear
        self._min_pallas_bytes = int(min_pallas_bytes)

    def __call__(self, input_value):
        return self.forward(input_value)

    def forward(self, input_value):
        x = input_value
        orig_shape = x.shape
        in_dtype = x.dtype

        # Output dtype: relu keeps dtype; tanh/sigmoid promote non-floats to
        # f32 (matching jnp semantics instead of truncating back to int).
        if self._kind == "relu" or jnp.issubdtype(in_dtype, jnp.floating):
            out_dtype = in_dtype
        else:
            out_dtype = jnp.float32

        n = x.size
        itemsize = jnp.dtype(in_dtype).itemsize

        # Small-input fallback: XLA's fused elementwise beats a custom call.
        if n == 0 or n * itemsize < self._min_pallas_bytes:
            return _apply_jnp(x, self._kind).astype(out_dtype)

        flat = x.reshape(-1)
        n_main = (n // _LANES) * _LANES
        if n_main == 0:
            return _apply_jnp(x, self._kind).astype(out_dtype)

        rows = n_main // _LANES
        # Lane-dense (rows, 128) slab; the common aligned case is a free
        # reshape (no pad/copy HBM round trip).
        if n_main == n:
            main2d = flat.reshape(rows, _LANES)
        else:
            main2d = flat[:n_main].reshape(rows, _LANES)

        tile_rows = _select_tile_rows(rows, itemsize)
        grid = (pl.cdiv(rows, tile_rows),)

        kernel = functools.partial(_nonlinearity_kernel, kind=self._kind)
        y2d = pl.pallas_call(
            kernel,
            out_shape=jax.ShapeDtypeStruct((rows, _LANES), out_dtype),
            grid_spec=pltpu.PrefetchScalarGridSpec(
                num_scalar_prefetch=0,
                grid=grid,
                in_specs=[pl.BlockSpec((tile_rows, _LANES), lambda i: (i, 0))],
                out_specs=pl.BlockSpec((tile_rows, _LANES), lambda i: (i, 0)),
            ),
            compiler_params=pltpu.CompilerParams(
                dimension_semantics=("parallel",),
                vmem_limit_bytes=_VMEM_LIMIT_BYTES,
            ),
        )(main2d)

        if n_main == n:
            return y2d.reshape(orig_shape)

        # Rare unaligned tail (< 128 elements): plain jnp, then stitch.
        y_tail = _apply_jnp(flat[n_main:], self._kind).astype(out_dtype)
        return jnp.concatenate([y2d.reshape(-1), y_tail]).reshape(orig_shape)

    def __repr__(self):
        return f"NonLinearity({self._kind})"


if __name__ == "__main__":
    key = jax.random.PRNGKey(0)

    # NCHW input, matching a PyTorch conv-style activation map.  Force the
    # Pallas path (min_pallas_bytes=0) so the kernel itself is exercised even
    # at this small demo size.
    x = jax.random.normal(key, (2, 4, 16, 16), dtype=jnp.float32)
    module = NonLinearity("tanh", min_pallas_bytes=0)
    y = jax.block_until_ready(module(x))
    ref = jnp.tanh(x)
    assert y.shape == x.shape and y.dtype == x.dtype
    assert jnp.max(jnp.abs(y - ref)) < 1e-6

    # Sigmoid / relu paths on the same input (forced Pallas path).
    ys = NonLinearity("sigmoid", min_pallas_bytes=0)(x)
    assert jnp.max(jnp.abs(ys - jax.nn.sigmoid(x))) < 1e-5
    yr = NonLinearity("relu", min_pallas_bytes=0)(x)
    assert jnp.max(jnp.abs(yr - jnp.maximum(x, 0))) < 1e-6

    # Larger input: exercises the multi-program grid (double-buffered,
    # TC-shardable) path with the default threshold.
    xb = jax.random.normal(jax.random.PRNGKey(1), (4, 8, 64, 64),
                           dtype=jnp.float32)  # 512 KiB -> grid of 2 programs
    yb = jax.block_until_ready(NonLinearity("tanh")(xb))
    assert jnp.max(jnp.abs(yb - jnp.tanh(xb))) < 1e-6

    # Unaligned element count + bf16: kernel on the 128-aligned prefix,
    # jnp on the <128-element tail.
    xu = jax.random.normal(jax.random.PRNGKey(2), (257, 7), dtype=jnp.bfloat16)
    yu = jax.block_until_ready(NonLinearity("sigmoid", min_pallas_bytes=0)(xu))
    ref_u = jax.nn.sigmoid(xu.astype(jnp.float32)).astype(jnp.bfloat16)
    assert yu.shape == xu.shape and yu.dtype == xu.dtype
    assert jnp.max(jnp.abs(yu.astype(jnp.float32)
                           - ref_u.astype(jnp.float32))) < 2e-2

    # Default-threshold small input takes the plain-jnp fallback path.
    y_small = NonLinearity("tanh")(x)
    assert jnp.max(jnp.abs(y_small - ref)) < 1e-6

    print("KERNEL_OK")
</pallas_src>

<mosaic_0001>
module attributes {stable_mosaic.version = 11 : i64} {
  func.func @_nonlinearity_kernel(%arg0: i32, %arg1: memref<16x128xf32, #tpu.memory_space<vmem>>, %arg2: memref<16x128xf32, #tpu.memory_space<vmem>>) attributes {dimension_semantics = [#tpu.dimension_semantics<parallel>], iteration_bounds = array<i64: 1>, scalar_prefetch = 0 : i64, scratch_operands = 0 : i64, tpu.core_type = #tpu.core_type<tc>, window_params = [{transform_indices = @transform_0, window_bounds = array<i64: 16, 128>}, {transform_indices = @transform_1, window_bounds = array<i64: 16, 128>}]} {
    %c0 = arith.constant 0 : index
    %c0_0 = arith.constant 0 : index
    %0 = vector.load %arg1[%c0, %c0_0] : memref<16x128xf32, #tpu.memory_space<vmem>>, vector<16x128xf32>
    %1 = math.tanh %0 : vector<16x128xf32>
    %c0_1 = arith.constant 0 : index
    %c0_2 = arith.constant 0 : index
    %2 = vector.load %arg2[%c0_1, %c0_2] : memref<16x128xf32, #tpu.memory_space<vmem>>, vector<16x128xf32>
    tpu.vector_store %arg2[%c0_1, %c0_2], %1 {strides = array<i32>} : memref<16x128xf32, #tpu.memory_space<vmem>>, vector<16x128xf32>,
    return
  }
  func.func @transform_0(%arg0: i32) -> (i32, i32) {
    %c0_i32 = arith.constant 0 : i32
    %c0_i32_0 = arith.constant 0 : i32
    return %arg0, %c0_i32 : i32, i32
  }
  func.func @transform_1(%arg0: i32) -> (i32, i32) {
    %c0_i32 = arith.constant 0 : i32
    %c0_i32_0 = arith.constant 0 : i32
    return %arg0, %c0_i32 : i32, i32
  }
}

</mosaic_0001>

<bundles_post_ra>
// kernel: tpu_custom_call.1
= control target key start
LH: loop header
LB: loop body
LE: loop exit
PB: predicated region body
PF: predicated region fallthrough
CT: control target
= control target key end

     0   :  { %6 = vsyncpa [#allocation3], 0  ;;  %s130_s0 = inlined_call_operand.hbm [shape: f32[16,128], index: 0, kind: input, shape index: {}]   ;;  %s131_s1 = inlined_call_operand.hbm [shape: f32[16,128], index: 1, kind: output, shape index: {}]  }
   0x1   :  { %7 = vsyncpa [#allocation4], 0  ;;  %s12_s8 = sshll.u32 %s130_s0, 4  ;;  %s110_s9 = smov [#allocation2]   ;;  %s13_s8 = int_to_ptr.hbm [resolvable:$true] %s12_s8 }
   0x2   :  { %s14_s10 = sshll.u32 %s110_s9, 4  ;;  %s111_s11 = smov 128   ;;  %s15_s10 = int_to_ptr.vmem [resolvable:$true] %s14_s10 }
   0x3   :  { %s112_s12 = smov 8  }
   0x4   :  { %20 = dma.hbm_to_vmem [thread:$0]  %s13_s8, 256, %s15_s10, [#allocation3], %s111_s11, %s111_s11, %s112_s12  }
   0x5   :  { %106 = dma.done.wait [#allocation3], 256  }
   0x6   :  { %107 = vsyncadd [#allocation3], 4294967040  ;;  %v25_v0 = vld [vmem:[#allocation2] sm:$0xff]  ;;  %v26_v1 = vld [vmem:[#allocation2 + $0x8] sm:$0xff]  ;;  %s113_s13 = smov [#allocation5]   ;;  %s37_s17 = sshll.u32 %s131_s1, 4  ;;  %s38_s17 = int_to_ptr.hbm [resolvable:$true] %s37_s17 }
   0x7   :  { %54 = vtanh.f32 %v25_v0  ;;  %s35_s14 = sshll.u32 %s113_s13, 4  ;;  %s36_s14 = int_to_ptr.vmem [resolvable:$true] %s35_s14 }
   0x8   :  { %56 = vtanh.f32 %v26_v1 }
   0xd   :  { %v55_v2 = vpop.eup %54 }
   0xe   :  { %v57_v3 = vpop.eup %56  ;;  %29 = vst [vmem:[#allocation5] sm:$0xff] %v55_v2 }
   0xf   :  { %30 = vst [vmem:[#allocation5 + $0x8] sm:$0xff] %v57_v3 }
  0x10   :  { %43 = dma.vmem_to_hbm [thread:$0]  %s36_s14, 256, %s38_s17, [#allocation4], %s111_s11, %s111_s11, %s112_s12  }
  0x11   :  { %108 = dma.done.wait [#allocation4], 256  }
  0x12   :  { %109 = vsyncadd [#allocation4], 4294967040 }
  0x13   :  { %48 = vsyncpa [#allocation3], 1 }
  0x14   :  { %49 = vsyncpa [#allocation4], 1 }

</bundles_post_ra>
